<compile_context>
chip_gen: v6e
topology: v6e:2x2x1
jax: 0.10.0
libtpu: 0.0.40
codegen_flags: <defaults>
</compile_context>

<pallas_src>
import jax
import jax.numpy as jnp
from jax.experimental import pallas as pl
from jax.experimental.pallas import tpu as pltpu


def _round_up(x, m):
    return (x + m - 1) // m * m


def _conv_relu_kernel(emb_ref, w_ref, b_ref, out_ref, xpad_ref):
    # emb_ref:  (1, S, D)          one batch's (unpadded) embedding tile
    # w_ref:    (fsz_max*D, N_pad) packed weights, resident across grid steps
    # b_ref:    (1, N_pad)         packed biases (f32)
    # out_ref:  (l_pad, N_pad)     lane-dense output tile for this batch
    # xpad_ref: (s_need, D)        VMEM scratch: emb rows followed by a zero tail
    _, S, D = emb_ref.shape
    K = w_ref.shape[0]
    fsz_max = K // D
    l_pad = out_ref.shape[0]
    s_need = xpad_ref.shape[0]

    # Fold the sequence padding into the kernel: zero only the tail rows that the
    # deepest tap can touch, then copy the real rows.  Every tap-slice below is
    # then a full-size, in-bounds read (no external jnp.pad pass over HBM).
    if s_need > S:
        xpad_ref[S:, :] = jnp.zeros((s_need - S, D), xpad_ref.dtype)
    xpad_ref[:S, :] = emb_ref[0]

    # Tap-wise accumulation (no im2col concat): fsz_max small MXU matmuls with
    # f32 accumulation, bias + ReLU fused in the epilogue.
    acc = jnp.zeros(out_ref.shape, jnp.float32)
    for k in range(fsz_max):
        xk = xpad_ref[k:k + l_pad, :]
        acc = acc + jnp.dot(xk, w_ref[k * D:(k + 1) * D, :],
                            preferred_element_type=jnp.float32)
    acc = acc + b_ref[...]
    out_ref[...] = jnp.maximum(acc, 0.0).astype(out_ref.dtype)


def prepare_cnn_params(params, filter_sizes, compute_dtype=jnp.float32):
    """One-time packing of the per-filter-size Conv2d parameters.

    params: list of (weight (F, 1, fsz, D), bias (F,)) in PyTorch Conv2d layout.
    Returns (w_packed (fsz_max*D, N_pad), b_packed (1, N_pad), meta).
    """
    filter_sizes = list(filter_sizes)
    fsz_max = max(filter_sizes)
    num_filter = params[0][0].shape[0]
    in_dim = params[0][0].shape[-1]
    n_total = num_filter * len(filter_sizes)
    n_pad = _round_up(n_total, 128)  # lane-dense output (unmasked vst)

    w_packed = jnp.zeros((fsz_max * in_dim, n_pad), jnp.float32)
    b_packed = jnp.zeros((1, n_pad), jnp.float32)
    for i, ((w, b), fsz) in enumerate(zip(params, filter_sizes)):
        # (F, 1, fsz, D) -> (fsz, D, F) -> (fsz*D, F); taps >= fsz stay zero.
        wt = jnp.transpose(w[:, 0, :, :], (1, 2, 0)).reshape(fsz * in_dim, num_filter)
        col0 = i * num_filter
        w_packed = w_packed.at[:fsz * in_dim, col0:col0 + num_filter].set(wt)
        b_packed = b_packed.at[0, col0:col0 + num_filter].set(b)

    meta = dict(filter_sizes=filter_sizes, fsz_max=fsz_max,
                num_filter=num_filter, in_dim=in_dim, n_pad=n_pad)
    return w_packed.astype(compute_dtype), b_packed, meta


def cnn_model_forward(emb, w_packed, b_packed, meta, out_dtype=None):
    """Fused forward. emb: (B, S, D) -> list of (B, S - fsz + 1, num_filter)."""
    B, S, D = emb.shape
    filter_sizes = meta["filter_sizes"]
    fsz_max = meta["fsz_max"]
    num_filter = meta["num_filter"]
    n_pad = meta["n_pad"]
    assert D == meta["in_dim"]
    # torch.squeeze() in the original forward silently drops any size-1 dim;
    # mirror its implicit assumption that B, NUM_FILTER and every L exceed 1.
    assert B > 1 and num_filter > 1 and min(S - f + 1 for f in filter_sizes) > 1

    l_max = S - min(filter_sizes) + 1
    l_pad = _round_up(l_max, 8)           # sublane-aligned rows per batch tile
    s_need = l_pad + fsz_max - 1          # emb rows any tap can touch
    k_dim = fsz_max * D
    out_dtype = emb.dtype if out_dtype is None else out_dtype

    emb_c = emb.astype(w_packed.dtype)    # no-op when dtypes already match

    itm_in = jnp.dtype(w_packed.dtype).itemsize
    itm_out = jnp.dtype(out_dtype).itemsize
    cost = pl.CostEstimate(
        flops=2 * B * l_pad * k_dim * n_pad,
        transcendentals=0,
        bytes_accessed=(B * S * D + k_dim * n_pad + n_pad) * itm_in
                       + B * l_pad * n_pad * itm_out)

    # VMEM budget: double-buffered emb/out tiles + resident weights + scratch,
    # clamped to v7x's 64 MiB physical VMEM.
    vmem_bytes = (2 * S * D * itm_in              # double-buffered emb tiles
                  + k_dim * n_pad * itm_in        # resident packed weights
                  + 2 * n_pad * 4                 # bias
                  + 2 * l_pad * n_pad * itm_out   # double-buffered output tiles
                  + s_need * D * itm_in           # scratch
                  + (8 << 20))                    # accumulator / compiler slack
    vmem_limit = int(min(max(_round_up(vmem_bytes, 1 << 20), 32 << 20), 64 << 20))

    grid_spec = pltpu.PrefetchScalarGridSpec(
        num_scalar_prefetch=0,
        grid=(B,),                                 # one batch tile per grid step
        in_specs=[
            pl.BlockSpec((1, S, D), lambda b: (b, 0, 0)),
            pl.BlockSpec((k_dim, n_pad), lambda b: (0, 0)),
            pl.BlockSpec((1, n_pad), lambda b: (0, 0)),
        ],
        out_specs=pl.BlockSpec((l_pad, n_pad), lambda b: (b, 0)),
        scratch_shapes=[pltpu.VMEM((s_need, D), w_packed.dtype)],
    )
    out = pl.pallas_call(
        _conv_relu_kernel,
        out_shape=jax.ShapeDtypeStruct((B * l_pad, n_pad), out_dtype),
        grid_spec=grid_spec,
        compiler_params=pltpu.CompilerParams(
            dimension_semantics=("parallel",),     # megacore on v7x
            vmem_limit_bytes=vmem_limit),
        cost_estimate=cost,
    )(emb_c, w_packed, b_packed)

    # Cheap metadata reshape + per-filter-size slicing back to the PyTorch list
    # layout.  NOTE: downstream consumers (e.g. a max-over-L pool) should prefer
    # the packed (B, l_pad, n_pad) slab to avoid re-reading lane-sparse slices.
    out = out.reshape(B, l_pad, n_pad)
    results = []
    for i, fsz in enumerate(filter_sizes):
        l_i = S - fsz + 1
        results.append(out[:, :l_i, i * num_filter:(i + 1) * num_filter])
    return results


def _reference_forward(emb, params, filter_sizes):
    outs = []
    for (w, b), fsz in zip(params, filter_sizes):
        B, S, _ = emb.shape
        L = S - fsz + 1
        windows = jnp.stack([emb[:, k:k + L, :] for k in range(fsz)], axis=2)  # (B,L,fsz,D)
        y = jnp.einsum("blkd,fkd->blf", windows, w[:, 0]) + b[None, None, :]
        outs.append(jnp.maximum(y, 0.0))
    return outs


if __name__ == "__main__":
    # Small shapes consistent with the module's forward:
    #   batch=2, seq=8, in_dim=32, NUM_FILTER=16, FILTER_SIZE="2,3,4"
    B, S, in_dim = 2, 8, 32
    num_filter = 16
    filter_sizes = [2, 3, 4]

    key = jax.random.PRNGKey(0)
    k_emb, *k_params = jax.random.split(key, 1 + 2 * len(filter_sizes))
    emb = jax.random.normal(k_emb, (B, S, in_dim), dtype=jnp.float32)

    params = []
    for i, fsz in enumerate(filter_sizes):
        kw, kb = k_params[2 * i], k_params[2 * i + 1]
        fan_in = 1 * fsz * in_dim
        bound = fan_in ** -0.5
        w = jax.random.uniform(kw, (num_filter, 1, fsz, in_dim),
                               minval=-bound, maxval=bound, dtype=jnp.float32)
        b = jax.random.uniform(kb, (num_filter,),
                               minval=-bound, maxval=bound, dtype=jnp.float32)
        params.append((w, b))

    # One-time parameter packing (hoisted out of the forward path).
    w_packed, b_packed, meta = prepare_cnn_params(params, filter_sizes)

    fwd = jax.jit(lambda e, w, b: cnn_model_forward(e, w, b, meta))
    outs = fwd(emb, w_packed, b_packed)
    outs = [jax.block_until_ready(o) for o in outs]

    refs = _reference_forward(emb, params, filter_sizes)
    for o, r, fsz in zip(outs, refs, filter_sizes):
        assert o.shape == (B, S - fsz + 1, num_filter), (o.shape, fsz)
        assert jnp.allclose(o, r, atol=1e-5, rtol=1e-5), f"mismatch for fsz={fsz}"

    # TODO(synk): nn.Dropout is declared in __init__ but never applied in forward(); omitted.
    print("KERNEL_OK")
</pallas_src>

<mosaic_0001>
module attributes {stable_mosaic.version = 11 : i64} {
  func.func @_conv_relu_kernel(%arg0: i32, %arg1: memref<1x8x32xf32, #tpu.memory_space<vmem>>, %arg2: memref<128x128xf32, #tpu.memory_space<vmem>>, %arg3: memref<1x128xf32, #tpu.memory_space<vmem>>, %arg4: memref<8x128xf32, #tpu.memory_space<vmem>>, %arg5: memref<11x32xf32, #tpu.memory_space<vmem>>) attributes {dimension_semantics = [#tpu.dimension_semantics<parallel>], iteration_bounds = array<i64: 2>, scalar_prefetch = 0 : i64, scratch_operands = 1 : i64, tpu.core_type = #tpu.core_type<tc>, window_params = [{transform_indices = @transform_0, window_bounds = array<i64: 1, 8, 32>}, {pipeline_mode = #tpu.pipeline_mode<synchronous>, transform_indices = @transform_1, window_bounds = array<i64: 128, 128>}, {pipeline_mode = #tpu.pipeline_mode<synchronous>, transform_indices = @transform_2, window_bounds = array<i64: 1, 128>}, {transform_indices = @transform_3, window_bounds = array<i64: 8, 128>}]} {
    %cst = arith.constant 0.000000e+00 : f32
    %0 = vector.broadcast %cst : f32 to vector<3x32xf32>
    %c8 = arith.constant 8 : index
    %c0 = arith.constant 0 : index
    %1 = vector.load %arg5[%c8, %c0] : memref<11x32xf32, #tpu.memory_space<vmem>>, vector<3x32xf32>
    tpu.vector_store %arg5[%c8, %c0], %0 {strides = array<i32>} : memref<11x32xf32, #tpu.memory_space<vmem>>, vector<3x32xf32>,
    %c0_0 = arith.constant 0 : index
    %c0_1 = arith.constant 0 : index
    %c0_2 = arith.constant 0 : index
    %2 = vector.load %arg1[%c0_0, %c0_1, %c0_2] : memref<1x8x32xf32, #tpu.memory_space<vmem>>, vector<1x8x32xf32>
    %3 = vector.shape_cast %2 : vector<1x8x32xf32> to vector<8x32xf32>
    %c0_3 = arith.constant 0 : index
    %c0_4 = arith.constant 0 : index
    %4 = vector.load %arg5[%c0_3, %c0_4] : memref<11x32xf32, #tpu.memory_space<vmem>>, vector<8x32xf32>
    tpu.vector_store %arg5[%c0_3, %c0_4], %3 {strides = array<i32>} : memref<11x32xf32, #tpu.memory_space<vmem>>, vector<8x32xf32>,
    %cst_5 = arith.constant 0.000000e+00 : f32
    %5 = vector.broadcast %cst_5 : f32 to vector<8x128xf32>
    %c0_6 = arith.constant 0 : index
    %c0_7 = arith.constant 0 : index
    %6 = vector.load %arg5[%c0_6, %c0_7] : memref<11x32xf32, #tpu.memory_space<vmem>>, vector<8x32xf32>
    %c0_8 = arith.constant 0 : index
    %c0_9 = arith.constant 0 : index
    %7 = vector.load %arg2[%c0_8, %c0_9] : memref<128x128xf32, #tpu.memory_space<vmem>>, vector<32x128xf32>
    %cst_10 = arith.constant dense<0.000000e+00> : vector<8x128xf32>
    %8 = tpu.matmul %6, %7, %cst_10 {dimension_numbers = #tpu.dot_dimension_numbers<[1], [0], [0], [1], [0, 0, 1, 1], [], []>} : vector<8x32xf32>, vector<32x128xf32>, vector<8x128xf32> -> vector<8x128xf32>
    %9 = arith.addf %5, %8 : vector<8x128xf32>
    %c1 = arith.constant 1 : index
    %c0_11 = arith.constant 0 : index
    %10 = vector.load %arg5[%c1, %c0_11] : memref<11x32xf32, #tpu.memory_space<vmem>>, vector<8x32xf32>
    %c32 = arith.constant 32 : index
    %c0_12 = arith.constant 0 : index
    %11 = vector.load %arg2[%c32, %c0_12] : memref<128x128xf32, #tpu.memory_space<vmem>>, vector<32x128xf32>
    %cst_13 = arith.constant dense<0.000000e+00> : vector<8x128xf32>
    %12 = tpu.matmul %10, %11, %cst_13 {dimension_numbers = #tpu.dot_dimension_numbers<[1], [0], [0], [1], [0, 0, 1, 1], [], []>} : vector<8x32xf32>, vector<32x128xf32>, vector<8x128xf32> -> vector<8x128xf32>
    %13 = arith.addf %9, %12 : vector<8x128xf32>
    %c2 = arith.constant 2 : index
    %c0_14 = arith.constant 0 : index
    %14 = vector.load %arg5[%c2, %c0_14] : memref<11x32xf32, #tpu.memory_space<vmem>>, vector<8x32xf32>
    %c64 = arith.constant 64 : index
    %c0_15 = arith.constant 0 : index
    %15 = vector.load %arg2[%c64, %c0_15] : memref<128x128xf32, #tpu.memory_space<vmem>>, vector<32x128xf32>
    %cst_16 = arith.constant dense<0.000000e+00> : vector<8x128xf32>
    %16 = tpu.matmul %14, %15, %cst_16 {dimension_numbers = #tpu.dot_dimension_numbers<[1], [0], [0], [1], [0, 0, 1, 1], [], []>} : vector<8x32xf32>, vector<32x128xf32>, vector<8x128xf32> -> vector<8x128xf32>
    %17 = arith.addf %13, %16 : vector<8x128xf32>
    %c3 = arith.constant 3 : index
    %c0_17 = arith.constant 0 : index
    %18 = vector.load %arg5[%c3, %c0_17] : memref<11x32xf32, #tpu.memory_space<vmem>>, vector<8x32xf32>
    %c96 = arith.constant 96 : index
    %c0_18 = arith.constant 0 : index
    %19 = vector.load %arg2[%c96, %c0_18] : memref<128x128xf32, #tpu.memory_space<vmem>>, vector<32x128xf32>
    %cst_19 = arith.constant dense<0.000000e+00> : vector<8x128xf32>
    %20 = tpu.matmul %18, %19, %cst_19 {dimension_numbers = #tpu.dot_dimension_numbers<[1], [0], [0], [1], [0, 0, 1, 1], [], []>} : vector<8x32xf32>, vector<32x128xf32>, vector<8x128xf32> -> vector<8x128xf32>
    %21 = arith.addf %17, %20 : vector<8x128xf32>
    %c0_20 = arith.constant 0 : index
    %c0_21 = arith.constant 0 : index
    %22 = vector.load %arg3[%c0_20, %c0_21] : memref<1x128xf32, #tpu.memory_space<vmem>>, vector<1x128xf32>
    %23 = vector.broadcast %22 : vector<1x128xf32> to vector<8x128xf32>
    %24 = arith.addf %21, %23 : vector<8x128xf32>
    %cst_22 = arith.constant 0.000000e+00 : f32
    %25 = vector.broadcast %cst_22 : f32 to vector<8x128xf32>
    %26 = arith.maximumf %24, %25 : vector<8x128xf32>
    %c0_23 = arith.constant 0 : index
    %c0_24 = arith.constant 0 : index
    %27 = vector.load %arg4[%c0_23, %c0_24] : memref<8x128xf32, #tpu.memory_space<vmem>>, vector<8x128xf32>
    tpu.vector_store %arg4[%c0_23, %c0_24], %26 {strides = array<i32>} : memref<8x128xf32, #tpu.memory_space<vmem>>, vector<8x128xf32>,
    return
  }
  func.func @transform_0(%arg0: i32) -> (i32, i32, i32) {
    %c0_i32 = arith.constant 0 : i32
    %c0_i32_0 = arith.constant 0 : i32
    %c0_i32_1 = arith.constant 0 : i32
    return %arg0, %c0_i32, %c0_i32_0 : i32, i32, i32
  }
  func.func @transform_1(%arg0: i32) -> (i32, i32) {
    %c0_i32 = arith.constant 0 : i32
    %c0_i32_0 = arith.constant 0 : i32
    %c0_i32_1 = arith.constant 0 : i32
    return %c0_i32, %c0_i32_0 : i32, i32
  }
  func.func @transform_2(%arg0: i32) -> (i32, i32) {
    %c0_i32 = arith.constant 0 : i32
    %c0_i32_0 = arith.constant 0 : i32
    %c0_i32_1 = arith.constant 0 : i32
    return %c0_i32, %c0_i32_0 : i32, i32
  }
  func.func @transform_3(%arg0: i32) -> (i32, i32) {
    %c0_i32 = arith.constant 0 : i32
    %c0_i32_0 = arith.constant 0 : i32
    return %arg0, %c0_i32 : i32, i32
  }
}

</mosaic_0001>

<bundles_post_ra>
// kernel: _lambda_.1
= control target key start
LH: loop header
LB: loop body
LE: loop exit
PB: predicated region body
PF: predicated region fallthrough
CT: control target
= control target key end

     0   :  { %8 = vsyncpa [#allocation4], 0  ;;  %s1010_s0 = inlined_call_operand.hbm [shape: f32[2,8,32], index: 0, kind: input, shape index: {}]   ;;  %s1011_s1 = inlined_call_operand.hbm [shape: f32[128,128], index: 1, kind: input, shape index: {}]   ;;  %s1012_s2 = inlined_call_operand.vmem [shape: f32[1,128], index: 2, kind: input, shape index: {}]   ;;  %s1013_s3 = inlined_call_operand.vmem [shape: f32[16,128], index: 3, kind: output, shape index: {}]  }
   0x1   :  { %10 = vsyncpa [#allocation4 + $0x1], 0 }
   0x2   :  { %11 = vsyncpa [#allocation6], 0  ;;  %s860_s12 = smov 0   ;;  %s862_s13 = smov 0  }
   0x3   :  { %s864_s14 = smov 0   ;;  %s866_s15 = smov 0  }
   0x4 LB: > { %s879_s16 = sadd.s32 4294967295, %s832_s15   ;;  %p37_p0 = scmp.ne.s32.totalorder %s824_s13, %s820_s12  ;;  %s832_s15 = sphi %s866_s15, %s1028_s15   ;;  %s828_s14 = sphi %s864_s14, %s1027_s14   ;;  %s824_s13 = sphi %s862_s13, %s1026_s13   ;;  %s820_s12 = sphi %s860_s12, %s1025_s12  }
   0x5   : > { %p1014_p1 = scmp.eq.s32.totalorder %s879_s16, 0  ;;  %p606_p2 = scmp.ge.s32.totalorder %s832_s15, 1 }
   0x6   : > { %p116_p3 = scmp.lt.s32.totalorder %s832_s15, 3  ;;  %s834_s19 = smov [#allocation5]  }
   0x7   : > { %p887_p4 = por %p1014_p1, %p37_p0  ;;  %s128_s20 = sshll.u32 %s834_s19, 4  ;;  %s129_s20 = int_to_ptr.vmem [resolvable:$true] %s128_s20 }
   0x8   : > { %p891_p5 = pnand %p606_p2, %p116_p3  ;;  %s904_s22 = sadd.s32 1, %s832_s15  }
   0x9   : > { %s1017_s17 = scalar_select %p887_p4, 1, 0 }
   0xa   : > { %s1018_s18 = scalar_select %p891_p5, 1, 0 }
   0xb   : > { %p692_p6 = pneg %p891_p5  ;;  %s24_s23 = sadd.s32 1, %s828_s14 }
   0xc   : > { %s21_s24 = ssub.s32 %s832_s15, %s904_s22  ;;  %s751_s25 = scalar_lea.vmem %s129_s20, 2048 }
   0xd   : > { %p899_p7 = pnand %p692_p6, %p1014_p1  ;;  %p752_p9 = scmp.ne.s32.totalorder %s129_s20, %s751_s25 }
   0xe   : > { %p759_p12 = scmp.lt.s32.totalorder %s129_s20, %s129_s20  ;;  %p760_p13 = scmp.lt.s32.totalorder %s751_s25, %s751_s25 }
   0xf   : > { %p742_p8 = pneg %p899_p7 }
  0x10   : > { %p761_p0 = por %p760_p13, %p759_p12 }
  0x11   : > { %p754_p10 = pnand %p752_p9, %p742_p8 }
  0x13   : > { %p755_p11 = pneg %p754_p10 }
  0x15   : > { %p762_p2 = pnand %p761_p0, %p755_p11 }
  0x17   : > { %765 = shalt.err (!%p762_p2)
}
  0x18   : > { %s835_s26 = smov 128   ;;  %s836_s27 = smov 8  }
  0x19   : > { %695 = dma.hbm_to_vmem [thread:$0]  (!%p899_p7), %s1011_s1, 2048, %s129_s20, [#allocation6], %s835_s26, %s835_s26, %s836_s27  }
  0x1a   : > { %p22_p3 = scmp.eq.s32.totalorder %s21_s24, 0  ;;  %p31_p6 = scmp.ne.s32.totalorder %s828_s14, %s824_s13 }
  0x1b   : > { %p32_p8 = scmp.eq.s32.totalorder %s832_s15, 0  ;;  %p701_p9 = scmp.lt.s32.totalorder %s832_s15, 2 }
  0x1c   : > { %s921_s30 = scalar_select %p22_p3, %s828_s14, %s24_s23  }
  0x1d   : > { %p33_p10 = por %p32_p8, %p31_p6  ;;  %s145_s4 = sand.u32 1, %s828_s14  }
  0x1e   : > { %s609_s5 = sshll.u32 %s145_s4, 3  ;;  %s610_s6 = sshll.u32 %s832_s15, 7 }
  0x1f   : > { %s928_s9 = scalar_lea.hbm %s1010_s0, %s610_s6  ;;  %s149_s10 = scalar_lea.vmem [#allocation3], %s609_s5 }
  0x20   : > { %s156_s11 = sshll.u32 %s149_s10, 4  ;;  %p930_p7 = pnand %p701_p9, %p33_p10  ;;  %s157_s11 = int_to_ptr.vmem [resolvable:$true] %s156_s11 }
  0x21   : > { %s146_s19 = scalar_lea.sflag [#allocation4], %s145_s4  ;;  %s766_s20 = scalar_lea.hbm %s928_s9, 128 }
  0x22   : > { %p767_p11 = scmp.ne.s32.totalorder %s928_s9, %s766_s20  ;;  %p768_p12 = pneg %p930_p7 }
  0x23   : > { %s771_s23 = scalar_lea.hbm %s1010_s0, 256  ;;  %p772_p2 = scmp.lt.s32.totalorder %s928_s9, %s1010_s0 }
  0x24   : > { %p769_p13 = pnand %p768_p12, %p767_p11  ;;  %p773_p3 = scmp.lt.s32.totalorder %s771_s23, %s766_s20 }
  0x26   : > { %p770_p0 = pneg %p769_p13  ;;  %p774_p6 = por %p773_p3, %p772_p2 }
  0x28   : > { %p775_p8 = pnand %p774_p6, %p770_p0 }
  0x2a   : > { %778 = shalt.err (!%p775_p8)
}
  0x2b   : > { %s779_s26 = scalar_lea.vmem %s157_s11, 128  ;;  %s837_s27 = smov [#allocation3]  }
  0x2c   : > { %p780_p9 = scmp.ne.s32.totalorder %s157_s11, %s779_s26  ;;  %s784_s28 = sshll.u32 %s837_s27, 4  ;;  %s785_s28 = int_to_ptr.vmem [resolvable:$false] %s784_s28 }
  0x2d   : > { %s786_s29 = scalar_lea.vmem %s785_s28, 256  ;;  %p787_p11 = scmp.lt.s32.totalorder %s157_s11, %s785_s28 }
  0x2e   : > { %p782_p10 = pnand %p780_p9, %p768_p12  ;;  %p788_p13 = scmp.lt.s32.totalorder %s786_s29, %s779_s26 }
  0x30   : > { %p783_p1 = pneg %p782_p10  ;;  %p789_p4 = por %p788_p13, %p787_p11 }
  0x32   : > { %p790_p5 = pnand %p789_p4, %p783_p1 }
  0x34   : > { %793 = shalt.err (!%p790_p5)
}
  0x35   : > { %699 = dma.hbm_to_vmem [thread:$0]  (!%p930_p7), %s928_s9, 128, %s157_s11, %s146_s19  }
  0x36   : > { %p1021_p0 = scmp.ne.s32.totalorder %s1018_s18, 0 }
  0x37   : > { %s167_s4 = sand.u32 (!%p1021_p0), 1, %s824_s13   ;;  %p1022_p12 = scmp.ne.s32.totalorder (!%p1021_p0), %s1017_s17, 0 }
  0x38   : > { %165 = sbr.rel (%p1021_p0) target bundleno = 287 (0x11f), region = 32  ;;  %s612_s5 = sshll.u32 (!%p1021_p0), %s167_s4, 3 }
  0x39   : > { %s168_s6 = scalar_lea.sflag (!%p1021_p0), [#allocation4], %s167_s4  ;;  %s171_s7 = scalar_lea.vmem (!%p1021_p0), [#allocation3], %s612_s5 }
  0x3d   : > { %811 = dma.done.wait (%p1022_p12), %s168_s6, 128  }
  0x3e   : > { %813 = vsyncadd (%p1022_p12), %s168_s6, 4294967168  ;;  %p1023_p1 = scmp.eq.s32.totalorder %s879_s16, 0 }
  0x40   : > { %815 = dma.done.wait (%p1023_p1), [#allocation6], 2048   ;;  %p1024_p4 = pmov %p1023_p1 }
  0x41   : > { %vm201_vm0 = vcmask 256000   ;;  %v838_v0 = vmov 0.0   ;;  %vm839_vm1 = vmmov 0   ;;  %v215_v1 = vld [vmem:[#allocation5 + $0x38] sm:$0xff]  ;;  %v214_v3 = vld [vmem:[#allocation5 + $0x30] sm:$0xff]  ;;  %vm204_vm2 = vcmask 261120  }
  0x42   : > { %817 = vsyncadd (%p1024_p4), [#allocation6], 4294965248  ;;  %642 = vmatprep.subr.mxu0 %v838_v0  ;;  %653 = vmatprep.subr.mxu1 %v838_v0  ;;  %202 = vst.msk [vmem:[#allocation2 + $0x8] sm:$0x7] %vm201_vm0, %v838_v0  ;;  %v210_v2 = vld [vmem:[#allocation5 + $0x18] sm:$0xff]  ;;  %v209_v4 = vld [vmem:[#allocation5 + $0x10] sm:$0xff] }
  0x43   : > { %650 = vmatprep.mubr.msk.f32.mxu0 %vm839_vm1, %v838_v0  ;;  %661 = vmatprep.mubr.msk.f32.mxu1 %vm839_vm1, %v838_v0  ;;  %v213_v5 = vld [vmem:[#allocation5 + $0x28] sm:$0xff]  ;;  %v203_v7 = vld [vmem:[%s171_s7] sm:$0xff]  ;;  %v212_v8 = vld [vmem:[#allocation5 + $0x20] sm:$0xff]  ;;  %p197_p5 = scmp.lt.s32.totalorder %s879_s16, 1 }
  0x44   : > { %643 = vmatpush3.msra.mxu0 %v215_v1  ;;  %654 = vmatpush3.msra.mxu1 %v210_v2  ;;  %v208_v6 = vld [vmem:[#allocation5 + $0x8] sm:$0xff]  ;;  %205 = vst.msk [vmem:[#allocation2] sm:$0xff] %vm204_vm2, %v203_v7  ;;  %v207_v9 = vld [vmem:[#allocation5] sm:$0xff]  ;;  %v366_v10 = vld [vmem:[#allocation5 + $0x58] sm:$0xff] }
  0x45   : > { %644 = vmatprep.subr.mxu0 %v838_v0  ;;  %655 = vmatprep.subr.mxu1 %v838_v0  ;;  %v445_v11 = vld [vmem:[#allocation5 + $0x78] sm:$0xff]  ;;  %v365_v14 = vld [vmem:[#allocation5 + $0x50] sm:$0xff]  ;;  %v364_v16 = vld [vmem:[#allocation5 + $0x48] sm:$0xff]  ;;  %s1030_s16 = smov (!%p197_p5, %s879_s16), 1 }
  0x46   : > { %645 = vmatpush3.msra.mxu0 %v214_v3  ;;  %656 = vmatpush3.msra.mxu1 %v209_v4  ;;  %v444_v15 = vld [vmem:[#allocation5 + $0x70] sm:$0xff]  ;;  %v443_v17 = vld [vmem:[#allocation5 + $0x68] sm:$0xff]  ;;  %v363_v18 = vld [vmem:[#allocation5 + $0x40] sm:$0xff]  ;;  %s614_s8 = sshll.u32 %s1030_s16, 3 }
  0x47   : > { %646 = vmatprep.subr.mxu0 %v838_v0  ;;  %657 = vmatprep.subr.mxu1 %v838_v0  ;;  %v442_v19 = vld [vmem:[#allocation5 + $0x60] sm:$0xff]  ;;  %v619_v30 = vld [vmem:[%s1012_s2] ss:$0 sm:$0xff]  ;;  %s200_s11 = scalar_lea.vmem %s1013_s3, %s614_s8 }
  0x48   : > { %647 = vmatpush3.msra.mxu0 %v213_v5  ;;  %658 = vmatpush3.msra.mxu1 %v208_v6 }
  0x49   : > { %648 = vmatprep.subr.mxu0 %v838_v0  ;;  %659 = vmatprep.subr.mxu1 %v838_v0 }
  0x4a   : > { %649 = vmatpush3.msra.mxu0 %v212_v8  ;;  %660 = vmatpush3.msra.mxu1 %v207_v9 }
  0x4b   : > { %664 = vmatprep.subr.mxu0 %v838_v0  ;;  %675 = vmatprep.subr.mxu1 %v838_v0  ;;  %v211_v12 = vld [vmem:[#allocation2 + $0x1] sm:$0xff] }
  0x4c   : > { %v206_v13 = vld [vmem:[#allocation2] sm:$0xff]  ;;  %651 = vmatmul.mubr.msk.f32.vlgmr.msra.gmra.mxu0 %vm204_vm2, %v211_v12 }
  0x4d   : > { %662 = vmatmul.mubr.msk.f32.vlgmr.msra.gmra.mxu1 %vm204_vm2, %v206_v13  ;;  %665 = vmatpush3.msra.mxu0 %v366_v10  ;;  %v362_v20 = vld [vmem:[#allocation2 + $0x2] sm:$0xff] }
  0x4e   : > { %676 = vmatpush3.msra.mxu1 %v445_v11  ;;  %666 = vmatprep.subr.mxu0 %v838_v0  ;;  %v441_v21 = vld [vmem:[#allocation2 + $0x3] sm:$0xff] }
  0x4f   : > { %677 = vmatprep.subr.mxu1 %v838_v0  ;;  %667 = vmatpush3.msra.mxu0 %v365_v14 }
  0x50   : > { %678 = vmatpush3.msra.mxu1 %v444_v15  ;;  %668 = vmatprep.subr.mxu0 %v838_v0 }
  0x51   : > { %679 = vmatprep.subr.mxu1 %v838_v0  ;;  %669 = vmatpush3.msra.mxu0 %v364_v16 }
  0x52   : > { %680 = vmatpush3.msra.mxu1 %v443_v17  ;;  %670 = vmatprep.subr.mxu0 %v838_v0 }
  0x53   : > { %681 = vmatprep.subr.mxu1 %v838_v0  ;;  %671 = vmatpush3.msra.mxu0 %v363_v18 }
  0x54   : > { %672 = vmatprep.mubr.msk.f32.mxu0 %vm839_vm1, %v838_v0  ;;  %682 = vmatpush3.msra.mxu1 %v442_v19 }
  0x55   : > { %683 = vmatprep.mubr.msk.f32.mxu1 %vm839_vm1, %v838_v0  ;;  %673 = vmatmul.mubr.msk.f32.vlgmr.msra.gmra.mxu0 %vm204_vm2, %v362_v20 }
  0x56   : > { %684 = vmatmul.mubr.msk.f32.vlgmr.msra.gmra.mxu1 %vm204_vm2, %v441_v21 }
 0x10c   : > { %v285_v22 = vpop.f32.mrf.mxu0 }
 0x10d   : > { %v358_v23 = vpop.f32.mrf.mxu1 }
 0x10e   : > { %v652_v24 = vpop.f32.mrf.mxu0  ;;  %v359_v26 = vadd.f32 %v358_v23, %v285_v22 }
 0x10f   : > { %v663_v25 = vpop.f32.mrf.mxu1 }
 0x115   : > { %v436_v27 = vpop.f32.mrf.mxu0 }
 0x116   : > { %v515_v28 = vpop.f32.mrf.mxu1  ;;  %v440_v29 = vadd.f32 %v436_v27, %v359_v26 }
 0x117   : > { %v674_v31 = vpop.f32.mrf.mxu0 }
 0x118   : > { %v685_v32 = vpop.f32.mrf.mxu1  ;;  %v519_v33 = vadd.f32 %v515_v28, %v440_v29 }
 0x11a   : > { %v527_v34 = vadd.f32 %v619_v30, %v519_v33 }
 0x11c   : > { %v528_v35 = vmax.f32 %v527_v34, 0.0 }
 0x11e   : > { %529 = vst [vmem:[%s200_s11] sm:$0xff] %v528_v35 }
 0x11f PF: > { %p14_p7 = scmp.ge.s32.totalorder %s904_s22, 4   ;;  %s1025_s12 = smov %s824_s13 }
 0x120   : > { %s1026_s13 = smov %s828_s14  ;;  %s1027_s14 = smov %s921_s30 }
 0x121   : > { %s1028_s15 = smov %s904_s22  ;;  %16 = sbr.rel (!%p14_p7) target bundleno = 4 (0x4), region = 76 }
 0x126   :  { %549 = vsyncpa [#allocation4], 1 }
 0x127   :  { %551 = vsyncpa [#allocation4 + $0x1], 1 }
 0x128   :  { %552 = vsyncpa [#allocation6], 1 }

</bundles_post_ra>
